<compile_context>
chip_gen: v6e
topology: v6e:2x2x1
jax: 0.10.0
libtpu: 0.0.40
codegen_flags: <defaults>
</compile_context>

<pallas_src>
import functools

import jax
import jax.numpy as jnp
from jax import lax
from jax.experimental import pallas as pl
from jax.experimental.pallas import tpu as pltpu


def _maxpool_linear_loss_kernel(feat_ref, wT_ref, shift_ref, out_ref, pooled_ref,
                                *, d_true, fold, t_total, t_rows, needs_mask):
    # feat_ref:   (tb, t_rows, fold*D)  VMEM, source dtype (streamed feature tile)
    # wT_ref:     (D, S_pad)            VMEM f32 (transposed Linear weight, zero-padded)
    # shift_ref:  (1, S_pad)            VMEM f32 (bias - scores, zero-padded)
    # out_ref:    (1, 8, 128)           VMEM f32 (per-B-tile partial loss sum, broadcast)
    # pooled_ref: (tb, fold*D)          VMEM scratch: running max over T (source dtype)
    t = pl.program_id(1)

    if jnp.issubdtype(pooled_ref.dtype, jnp.floating):
        neg = jnp.array(-jnp.inf, dtype=pooled_ref.dtype)
    else:
        neg = jnp.array(jnp.iinfo(pooled_ref.dtype).min, dtype=pooled_ref.dtype)

    @pl.when(t == 0)
    def _init():
        pooled_ref[...] = jnp.full(pooled_ref.shape, neg, dtype=pooled_ref.dtype)

    tile = feat_ref[...]
    if needs_mask:
        # Masked tail: rows past the true T extent hold unspecified data -> mask to
        # the max identity so they never win the running max.
        rows = lax.broadcasted_iota(jnp.int32, (1, t_rows, 1), 1)
        valid = t_total - t * t_rows
        tile = jnp.where(rows < valid, tile, neg)

    # Incremental running max over this T tile (keeps the working set to one block so
    # the reduce overlaps the next DMA instead of one giant max over all of T).
    tile_max = jnp.max(tile, axis=1)                                  # (tb, fold*D)
    pooled_ref[...] = jnp.maximum(pooled_ref[...],
                                  tile_max.astype(pooled_ref.dtype))

    @pl.when(t == pl.num_programs(1) - 1)
    def _finalize():
        # Undo the lane fold: max over the `fold` time slices packed into the lanes.
        packed = pooled_ref[...].astype(jnp.float32)                  # (tb, fold*D)
        pooled = packed[:, 0:d_true]
        for j in range(1, fold):
            pooled = jnp.maximum(pooled, packed[:, j * d_true:(j + 1) * d_true])

        # Lane-dense Linear: S padded to 128 lanes; padded columns carry zero
        # weight and zero (bias - scores), so they add exactly 0 to the loss sum.
        pred = jnp.dot(pooled, wT_ref[...],
                       preferred_element_type=jnp.float32)            # (tb, S_pad) MXU
        diff = pred + shift_ref[...]          # pred + (bias - scores) == pred' - scores
        sq = jnp.abs(diff * diff)             # matches torch.abs((pred - scores) ** 2)
        # Lane-dense unmasked store of the per-B-tile partial sum (broadcast scalar).
        out_ref[...] = jnp.full(out_ref.shape, jnp.sum(sq), dtype=jnp.float32)


def _largest_divisor_leq(n, cap):
    for c in range(min(n, cap), 0, -1):
        if n % c == 0:
            return c
    return 1


def _pick_time_tile(t_total, rows_target, sub):
    """Time rows per tile: the full axis if it fits, else the largest multiple of the
    dtype's packed sublane count (`sub`) that fits the byte budget.  Non-divisible
    totals are handled with a masked tail in the kernel (no full-axis fallback)."""
    if t_total <= rows_target:
        return t_total
    tt = max(sub, (rows_target // sub) * sub)
    return min(tt, t_total)


def regression_loss_maxpool(features, scores, weight, bias):
    """features: (B, T, D); scores: (S,); weight: (S, D); bias: (S,). Returns scalar."""
    B, T, D = features.shape
    S = scores.shape[0]

    # --- lane packing: fold a factor of T into the lane dim when D < 128.
    # (reshape merges contiguous trailing dims -> no data movement in HBM)
    fold = 1
    if D < 128:
        for f in range(min(max(1, 128 // D), T), 0, -1):
            if T % f == 0:
                fold = f
                break
    t_packed = T // fold
    d_packed = D * fold
    feats = features.reshape(B, t_packed, d_packed) if fold > 1 else features

    # --- pad the Linear output dim to a full 128-lane tile; fold bias and scores into
    # a single resident operand (zeros in the padding contribute 0 loss).
    s_pad = ((S + 127) // 128) * 128
    wT = jnp.zeros((D, s_pad), jnp.float32).at[:, :S].set(weight.T.astype(jnp.float32))
    shift = jnp.zeros((1, s_pad), jnp.float32).at[0, :S].set(
        bias.astype(jnp.float32) - scores.astype(jnp.float32))

    # --- tile sizes: ~12 MiB feature blocks (24 MiB double-buffered).  This is inside
    # the review's recommended 8-16 MiB band for v7x (fast HBM => per-step overhead is
    # most expensive there) and comfortably within v6e/v5e VMEM as well.
    itemsize = jnp.dtype(feats.dtype).itemsize
    sub = 8 * max(1, 4 // itemsize)            # packed-sublane multiple: 8/16/32
    target_bytes = 12 << 20

    per_row_bytes = t_packed * d_packed * itemsize
    if per_row_bytes <= target_bytes:
        # Whole (packed) T fits one tile: amortize the per-B-tile epilogue by packing
        # as many batch rows per tile as the byte budget allows (capped at 64).
        cap = max(1, min(64, target_bytes // max(1, per_row_bytes)))
    else:
        cap = 8
    tb = _largest_divisor_leq(B, cap)
    if B >= 2 and B // tb < 2:
        # Ensure nb >= 2 so the "parallel" B axis can shard across v7x's 2 TensorCores.
        tb = _largest_divisor_leq(B, max(1, B // 2))
    nb = B // tb

    rows_target = max(1, target_bytes // max(1, tb * d_packed * itemsize))
    tt = _pick_time_tile(t_packed, rows_target, sub)
    nt = -(-t_packed // tt)                    # cdiv: masked tail handles remainders
    needs_mask = (t_packed % tt) != 0

    feat_block_bytes = tb * tt * d_packed * itemsize
    resident_bytes = (D * s_pad + s_pad) * 4
    pooled_bytes = tb * d_packed * itemsize
    out_bytes = 8 * 128 * 4
    vmem_limit = (2 * feat_block_bytes + 2 * resident_bytes + 2 * out_bytes
                  + pooled_bytes + (4 << 20))
    vmem_limit = int(min(max(vmem_limit, 16 << 20), 48 << 20))

    kernel = functools.partial(
        _maxpool_linear_loss_kernel,
        d_true=D, fold=fold, t_total=t_packed, t_rows=tt, needs_mask=needs_mask)

    cost = pl.CostEstimate(
        flops=int(2 * B * D * s_pad + B * t_packed * d_packed),
        transcendentals=0,
        bytes_accessed=int(B * t_packed * d_packed * itemsize
                           + resident_bytes + nb * out_bytes),
    )

    partials = pl.pallas_call(
        kernel,
        out_shape=jax.ShapeDtypeStruct((nb, 8, 128), jnp.float32),
        grid_spec=pltpu.PrefetchScalarGridSpec(
            num_scalar_prefetch=0,
            grid=(nb, nt),                               # reduction (T) axis last
            in_specs=[
                pl.BlockSpec((tb, tt, d_packed), lambda b, t: (b, t, 0)),
                pl.BlockSpec((D, s_pad), lambda b, t: (0, 0)),
                pl.BlockSpec((1, s_pad), lambda b, t: (0, 0)),
            ],
            out_specs=pl.BlockSpec((1, 8, 128), lambda b, t: (b, 0, 0)),
            scratch_shapes=[pltpu.VMEM((tb, d_packed), feats.dtype)],
        ),
        compiler_params=pltpu.CompilerParams(
            dimension_semantics=("parallel", "arbitrary"),
            vmem_limit_bytes=vmem_limit,
        ),
        cost_estimate=cost,
    )(feats, wT, shift)

    # Tiny final reduction in plain JAX; divide by the true B*S (padding added 0).
    return jnp.sum(partials[:, 0, 0]) / jnp.float32(B * S)


def _reference(features, scores, weight, bias):
    pooled = jnp.max(features, axis=1)                    # (B, D)
    pred = pooled @ weight.T + bias                       # (B, S)
    return jnp.mean(jnp.abs((pred - scores[None, :]) ** 2))


if __name__ == "__main__":
    # Small shapes consistent with the forward pass.
    B, T, D = 2, 8, 32       # batch, seq-len (pooling window), feature dim
    S = 2                    # scores.size(0) -> Linear out features

    key = jax.random.PRNGKey(0)
    k_feat, k_scores, k_w, k_b = jax.random.split(key, 4)

    features = jax.random.normal(k_feat, (B, T, D), dtype=jnp.float32)
    scores = jax.random.normal(k_scores, (S,), dtype=jnp.float32)

    # Deterministic Linear(D, S) init (mimics torch's uniform(-1/sqrt(D), 1/sqrt(D))).
    bound = 1.0 / jnp.sqrt(jnp.float32(D))
    weight = jax.random.uniform(k_w, (S, D), minval=-bound, maxval=bound,
                                dtype=jnp.float32)
    bias = jax.random.uniform(k_b, (S,), minval=-bound, maxval=bound,
                              dtype=jnp.float32)

    loss = regression_loss_maxpool(features, scores, weight, bias)
    loss = jax.block_until_ready(loss)

    ref = _reference(features, scores, weight, bias)
    assert jnp.allclose(loss, ref, rtol=1e-5, atol=1e-5), (loss, ref)

    print("KERNEL_OK")
</pallas_src>

<mosaic_0001>
module attributes {stable_mosaic.version = 11 : i64} {
  func.func @_maxpool_linear_loss_kernel(%arg0: i32, %arg1: i32, %arg2: memref<1x2x128xf32, #tpu.memory_space<vmem>>, %arg3: memref<32x128xf32, #tpu.memory_space<vmem>>, %arg4: memref<1x128xf32, #tpu.memory_space<vmem>>, %arg5: memref<1x8x128xf32, #tpu.memory_space<vmem>>, %arg6: memref<1x128xf32, #tpu.memory_space<vmem>>) attributes {dimension_semantics = [#tpu.dimension_semantics<parallel>, #tpu.dimension_semantics<arbitrary>], iteration_bounds = array<i64: 2, 1>, scalar_prefetch = 0 : i64, scratch_operands = 1 : i64, tpu.core_type = #tpu.core_type<tc>, window_params = [{transform_indices = @transform_0, window_bounds = array<i64: 1, 2, 128>}, {pipeline_mode = #tpu.pipeline_mode<synchronous>, transform_indices = @transform_1, window_bounds = array<i64: 32, 128>}, {pipeline_mode = #tpu.pipeline_mode<synchronous>, transform_indices = @transform_2, window_bounds = array<i64: 1, 128>}, {transform_indices = @transform_3, window_bounds = array<i64: 1, 8, 128>}]} {
    %c0_i32 = arith.constant 0 : i32
    %0 = arith.cmpi eq, %arg1, %c0_i32 : i32
    %1 = arith.extui %0 : i1 to i32
    %cst = arith.constant 0xFF800000 : f32
    %c0_i32_0 = arith.constant 0 : i32
    %2 = arith.cmpi ne, %1, %c0_i32_0 : i32
    scf.if %2 {
      %11 = vector.broadcast %cst : f32 to vector<1x128xf32>
      %c0_10 = arith.constant 0 : index
      %c0_11 = arith.constant 0 : index
      %12 = vector.load %arg6[%c0_10, %c0_11] : memref<1x128xf32, #tpu.memory_space<vmem>>, vector<1x128xf32>
      tpu.vector_store %arg6[%c0_10, %c0_11], %11 {strides = array<i32>} : memref<1x128xf32, #tpu.memory_space<vmem>>, vector<1x128xf32>,
    } else {
    }
    %c0 = arith.constant 0 : index
    %c0_1 = arith.constant 0 : index
    %c0_2 = arith.constant 0 : index
    %3 = vector.load %arg2[%c0, %c0_1, %c0_2] : memref<1x2x128xf32, #tpu.memory_space<vmem>>, vector<1x2x128xf32>
    %cst_3 = arith.constant dense<0xFF800000> : vector<1x128xf32>
    %4 = vector.multi_reduction <maximumf>, %3, %cst_3 [1] : vector<1x2x128xf32> to vector<1x128xf32>
    %c0_4 = arith.constant 0 : index
    %c0_5 = arith.constant 0 : index
    %5 = vector.load %arg6[%c0_4, %c0_5] : memref<1x128xf32, #tpu.memory_space<vmem>>, vector<1x128xf32>
    %6 = arith.maximumf %5, %4 : vector<1x128xf32>
    %c0_6 = arith.constant 0 : index
    %c0_7 = arith.constant 0 : index
    %7 = vector.load %arg6[%c0_6, %c0_7] : memref<1x128xf32, #tpu.memory_space<vmem>>, vector<1x128xf32>
    tpu.vector_store %arg6[%c0_6, %c0_7], %6 {strides = array<i32>} : memref<1x128xf32, #tpu.memory_space<vmem>>, vector<1x128xf32>,
    %c0_i32_8 = arith.constant 0 : i32
    %8 = arith.cmpi eq, %arg1, %c0_i32_8 : i32
    %9 = arith.extui %8 : i1 to i32
    %c0_i32_9 = arith.constant 0 : i32
    %10 = arith.cmpi ne, %9, %c0_i32_9 : i32
    scf.if %10 {
      %c0_10 = arith.constant 0 : index
      %c0_11 = arith.constant 0 : index
      %11 = vector.load %arg6[%c0_10, %c0_11] : memref<1x128xf32, #tpu.memory_space<vmem>>, vector<1x128xf32>
      %12 = vector.extract_strided_slice %11 {offsets = [0, 0], sizes = [1, 32], strides = [1, 1]} : vector<1x128xf32> to vector<1x32xf32>
      %13 = vector.extract_strided_slice %11 {offsets = [0, 32], sizes = [1, 32], strides = [1, 1]} : vector<1x128xf32> to vector<1x32xf32>
      %14 = arith.maximumf %12, %13 : vector<1x32xf32>
      %15 = vector.extract_strided_slice %11 {offsets = [0, 64], sizes = [1, 32], strides = [1, 1]} : vector<1x128xf32> to vector<1x32xf32>
      %16 = arith.maximumf %14, %15 : vector<1x32xf32>
      %17 = vector.extract_strided_slice %11 {offsets = [0, 96], sizes = [1, 32], strides = [1, 1]} : vector<1x128xf32> to vector<1x32xf32>
      %18 = arith.maximumf %16, %17 : vector<1x32xf32>
      %c0_12 = arith.constant 0 : index
      %c0_13 = arith.constant 0 : index
      %19 = vector.load %arg3[%c0_12, %c0_13] : memref<32x128xf32, #tpu.memory_space<vmem>>, vector<32x128xf32>
      %cst_14 = arith.constant dense<0.000000e+00> : vector<1x128xf32>
      %20 = tpu.matmul %18, %19, %cst_14 {dimension_numbers = #tpu.dot_dimension_numbers<[1], [0], [0], [1], [0, 0, 1, 1], [], []>} : vector<1x32xf32>, vector<32x128xf32>, vector<1x128xf32> -> vector<1x128xf32>
      %c0_15 = arith.constant 0 : index
      %c0_16 = arith.constant 0 : index
      %21 = vector.load %arg4[%c0_15, %c0_16] : memref<1x128xf32, #tpu.memory_space<vmem>>, vector<1x128xf32>
      %22 = arith.addf %20, %21 : vector<1x128xf32>
      %23 = arith.mulf %22, %22 : vector<1x128xf32>
      %24 = math.absf %23 : vector<1x128xf32>
      %25 = vector.shape_cast %24 : vector<1x128xf32> to vector<1x1x128xf32>
      %cst_17 = arith.constant dense<0.000000e+00> : vector<1xf32>
      %26 = vector.multi_reduction <add>, %25, %cst_17 [1, 2] : vector<1x1x128xf32> to vector<1xf32>
      %27 = vector.shape_cast %26 : vector<1xf32> to vector<1x1x1xf32>
      %28 = vector.extract %27[0, 0, 0] : f32 from vector<1x1x1xf32>
      %29 = vector.broadcast %28 : f32 to vector<1x8x128xf32>
      %c0_18 = arith.constant 0 : index
      %c0_19 = arith.constant 0 : index
      %c0_20 = arith.constant 0 : index
      %30 = vector.load %arg5[%c0_18, %c0_19, %c0_20] : memref<1x8x128xf32, #tpu.memory_space<vmem>>, vector<1x8x128xf32>
      tpu.vector_store %arg5[%c0_18, %c0_19, %c0_20], %29 {strides = array<i32>} : memref<1x8x128xf32, #tpu.memory_space<vmem>>, vector<1x8x128xf32>,
    } else {
    }
    return
  }
  func.func @transform_0(%arg0: i32, %arg1: i32) -> (i32, i32, i32) {
    %c0_i32 = arith.constant 0 : i32
    %c0_i32_0 = arith.constant 0 : i32
    return %arg0, %arg1, %c0_i32 : i32, i32, i32
  }
  func.func @transform_1(%arg0: i32, %arg1: i32) -> (i32, i32) {
    %c0_i32 = arith.constant 0 : i32
    %c0_i32_0 = arith.constant 0 : i32
    %c0_i32_1 = arith.constant 0 : i32
    return %c0_i32, %c0_i32_0 : i32, i32
  }
  func.func @transform_2(%arg0: i32, %arg1: i32) -> (i32, i32) {
    %c0_i32 = arith.constant 0 : i32
    %c0_i32_0 = arith.constant 0 : i32
    %c0_i32_1 = arith.constant 0 : i32
    return %c0_i32, %c0_i32_0 : i32, i32
  }
  func.func @transform_3(%arg0: i32, %arg1: i32) -> (i32, i32, i32) {
    %c0_i32 = arith.constant 0 : i32
    %c0_i32_0 = arith.constant 0 : i32
    %c0_i32_1 = arith.constant 0 : i32
    return %arg0, %c0_i32, %c0_i32_0 : i32, i32, i32
  }
}

</mosaic_0001>

<bundles_post_ra>
// kernel: tpu_custom_call.1
= control target key start
LH: loop header
LB: loop body
LE: loop exit
PB: predicated region body
PF: predicated region fallthrough
CT: control target
= control target key end

     0   :  { %8 = vsyncpa [#allocation4], 0  ;;  %s910_s0 = inlined_call_operand.hbm [shape: f32[2,2,128], index: 0, kind: input, shape index: {}]   ;;  %s911_s1 = inlined_call_operand.hbm [shape: f32[32,128], index: 1, kind: input, shape index: {}]   ;;  %s912_s2 = inlined_call_operand.vmem [shape: f32[1,128], index: 2, kind: input, shape index: {}]   ;;  %s913_s3 = inlined_call_operand.hbm [shape: f32[2,8,128], index: 3, kind: output, shape index: {}]  }
   0x1   :  { %10 = vsyncpa [#allocation4 + $0x1], 0 }
   0x2   :  { %11 = vsyncpa [#allocation7], 0 }
   0x3   :  { %12 = vsyncpa [#allocation5], 0 }
   0x4   :  { %14 = vsyncpa [#allocation5 + $0x1], 0  ;;  %s733_s12 = smov 0   ;;  %s735_s13 = smov 0  }
   0x5   :  { %s737_s14 = smov 0   ;;  %s739_s15 = smov 0  }
   0x6   :  { %s741_s16 = smov 0   ;;  %s743_s17 = smov 0  }
   0x7 LB: > { %s447_s18 = sadd.s32 4294967295, %s700_s17   ;;  %s448_s19 = sadd.s32 4294967294, %s700_s17   ;;  %s700_s17 = sphi %s743_s17, %s20_s17   ;;  %s696_s16 = sphi %s741_s16, %s931_s16   ;;  %s692_s15 = sphi %s739_s15, %s930_s15   ;;  %s688_s14 = sphi %s737_s14, %s929_s14   ;;  %s684_s13 = sphi %s735_s13, %s928_s13   ;;  %s680_s12 = sphi %s733_s12, %s927_s12  }
   0x8   : > { %p54_p0 = scmp.ne.s32.totalorder %s684_s13, %s680_s12  ;;  %p767_p1 = scmp.eq.s32.totalorder %s447_s18, 0 }
   0x9   : > { %p771_p2 = scmp.eq.s32.totalorder %s447_s18, 1  ;;  %p126_p3 = scmp.eq.s32.totalorder %s448_s19, 1 }
   0xa   : > { %p777_p4 = por %p767_p1, %p54_p0  ;;  %p449_p5 = scmp.ge.s32.totalorder %s700_s17, 1 }
   0xb   : > { %p782_p6 = por %p126_p3, %p54_p0  ;;  %p133_p7 = scmp.lt.s32.totalorder %s700_s17, 3 }
   0xc   : > { %s917_s22 = scalar_select %p777_p4, 1, 0 }
   0xd   : > { %s918_s23 = scalar_select %p782_p6, 1, 0 }
   0xe   : > { %p787_p8 = pnand %p449_p5, %p133_p7  ;;  %s702_s25 = smov [#allocation6]  }
   0xf   : > { %s145_s26 = sshll.u32 %s702_s25, 4  ;;  %s32_s28 = sadd.s32 1, %s696_s16  ;;  %s146_s26 = int_to_ptr.vmem [resolvable:$true] %s145_s26 }
  0x10   : > { %p489_p9 = pneg %p787_p8  ;;  %s573_s29 = scalar_lea.vmem %s146_s26, 512 }
  0x11   : > { %p574_p13 = scmp.ne.s32.totalorder %s146_s26, %s573_s29  ;;  %p581_p5 = scmp.lt.s32.totalorder %s146_s26, %s146_s26 }
  0x12   : > { %p796_p11 = pnand %p489_p9, %p767_p1  ;;  %p582_p7 = scmp.lt.s32.totalorder %s573_s29, %s573_s29 }
  0x14   : > { %p564_p12 = pneg %p796_p11  ;;  %p583_p6 = por %p582_p7, %p581_p5 }
  0x16   : > { %p576_p0 = pnand %p574_p13, %p564_p12 }
  0x18   : > { %p577_p3 = pneg %p576_p0 }
  0x1a   : > { %p584_p4 = pnand %p583_p6, %p577_p3 }
  0x1c   : > { %587 = shalt.err (!%p584_p4)
}
  0x1d   : > { %s703_s30 = smov 128   ;;  %s704_s4 = smov 8  }
  0x1e   : > { %492 = dma.hbm_to_vmem [thread:$0]  (!%p796_p11), %s911_s1, 512, %s146_s26, [#allocation7], %s703_s30, %s703_s30, %s704_s4  }
  0x1f   : > { %p34_p6 = scmp.ge.s32.totalorder %s32_s28, 2  ;;  %s41_s7 = sadd.s32 1, %s688_s14 }
  0x20   : > { %p48_p4 = scmp.ne.s32.totalorder %s688_s14, %s684_s13  ;;  %p49_p9 = scmp.eq.s32.totalorder %s700_s17, 0 }
  0x21   : > { %s933_s28 = smov (%p34_p6, %s32_s28), 0  ;;  %p502_p0 = scmp.lt.s32.totalorder %s700_s17, 2 }
  0x22   : > { %p814_p12 = por %p49_p9, %p48_p4  ;;  %p820_p13 = por %p771_p2, %p48_p4 }
  0x23   : > { %s36_s10 = ssub.s32 %s696_s16, %s933_s28  ;;  %s162_s11 = sand.u32 1, %s688_s14  }
  0x24   : > { %p39_p11 = scmp.eq.s32.totalorder %s36_s10, 0  ;;  %s452_s18 = sshll.u32 %s162_s11, 1 }
  0x25   : > { %s453_s25 = sshll.u32 %s696_s16, 5  ;;  %s166_s30 = scalar_lea.vmem [#allocation3], %s452_s18 }
  0x26   : > { %s829_s19 = scalar_select %p39_p11, %s688_s14, %s41_s7  }
  0x27   : > { %s172_s29 = scalar_lea.hbm %s910_s0, %s453_s25  ;;  %s174_s4 = sshll.u32 %s166_s30, 4  ;;  %s175_s4 = int_to_ptr.vmem [resolvable:$true] %s174_s4 }
  0x28   : > { %p837_p2 = pnand %p502_p0, %p814_p12  ;;  %s163_s5 = scalar_lea.sflag [#allocation4], %s162_s11 }
  0x29   : > { %s601_s6 = scalar_lea.vmem %s175_s4, 32  ;;  %s705_s7 = smov [#allocation3]  }
  0x2a   : > { %p590_p3 = pneg %p837_p2  ;;  %p602_p5 = scmp.ne.s32.totalorder %s175_s4, %s601_s6 }
  0x2b   : > { %s606_s10 = sshll.u32 %s705_s7, 4  ;;  %s607_s10 = int_to_ptr.vmem [resolvable:$false] %s606_s10 }
  0x2c   : > { %p604_p7 = pnand %p602_p5, %p590_p3  ;;  %s608_s25 = scalar_lea.vmem %s607_s10, 64 }
  0x2d   : > { %p609_p4 = scmp.lt.s32.totalorder %s175_s4, %s607_s10  ;;  %p610_p9 = scmp.lt.s32.totalorder %s608_s25, %s601_s6 }
  0x2e   : > { %p605_p6 = pneg %p604_p7 }
  0x2f   : > { %p611_p11 = por %p610_p9, %p609_p4 }
  0x31   : > { %p612_p10 = pnand %p611_p11, %p605_p6 }
  0x33   : > { %615 = shalt.err (!%p612_p10)
}
  0x34   : > { %496 = dma.hbm_to_vmem [thread:$0]  (!%p837_p2), %s172_s29, 32, %s175_s4, %s163_s5  }
  0x35   : > { %183 = sbr.rel (%p787_p8) target bundleno = 622 (0x26e), region = 32  ;;  %s848_s8 = sand.u32 (!%p787_p8), 1, %s684_s13  }
  0x36   : > { %s455_s11 = sshll.u32 (!%p787_p8), %s848_s8, 1  ;;  %s186_s18 = scalar_lea.sflag (!%p787_p8), [#allocation4], %s848_s8 }
  0x37   : > { %s189_s26 = scalar_lea.vmem (!%p787_p8), [#allocation3], %s455_s11  ;;  %p924_p12 = scmp.ne.s32.totalorder (!%p787_p8), %s917_s22, 0 }
  0x3a   : > { %667 = dma.done.wait (%p924_p12), %s186_s18, 32  }
  0x3b   : > { %669 = vsyncadd (%p924_p12), %s186_s18, 4294967264 }
  0x3c   : > { %671 = dma.done.wait (%p767_p1), [#allocation7], 512  }
  0x3d   : > { %673 = vsyncadd (%p767_p1), [#allocation7], 4294966784  ;;  %v706_v0 = vmov -inf   ;;  %vm222_vm0 = vcmask 1041408   ;;  %v221_v1 = vld [vmem:[%s189_s26] sm:$0x3] }
  0x3e   : > { %220 = vst [vmem:[#allocation2] sm:$0x1] %v706_v0  ;;  %v223_v2 = vsel %vm222_vm0, %v221_v1, -inf  ;;  %v707_v9 = vmov 0.0   ;;  %v253_v10 = vld [vmem:[#allocation6 + $0x18] sm:$0xff]  ;;  %v252_v11 = vld [vmem:[#allocation6 + $0x10] sm:$0xff] }
  0x3f   : > { %v224_v3 = vrot.slane %v223_v2, 4  ;;  %468 = vmatprep.subr.mxu0 %v707_v9  ;;  %v251_v14 = vld [vmem:[#allocation6 + $0x8] sm:$0xff]  ;;  %v250_v15 = vld [vmem:[#allocation6] sm:$0xff]  ;;  %vm708_vm1 = vmmov 0   ;;  %s709_s20 = smov 96   ;;  %s710_s22 = smov 32  }
  0x40   : > { %469 = vmatpush3.msra.mxu0 %v253_v10  ;;  %476 = vmatprep.mubr.msk.f32.mxu0 %vm708_vm1, %v707_v9  ;;  %s711_s24 = smov 64   ;;  %vm255_vm2 = vcmask 261120   ;;  %v254_v23 = vld [vmem:[%s912_s2] sm:$0x1]  ;;  %vm331_vm3 = vcmask 1040384   ;;  %s457_s30 = sshll.u32 %s848_s8, 3 }
  0x41   : > { %v225_v4 = vmax.f32 %v223_v2, %v224_v3  ;;  %470 = vmatprep.subr.mxu0 %v707_v9  ;;  %s215_s4 = scalar_lea.vmem [#allocation8], %s457_s30  ;;  %s460_s5 = sshll.u32 %s692_s15, 7 }
  0x42   : > { %471 = vmatpush3.msra.mxu0 %v252_v11  ;;  %s358_s21 = sshll.u32 %s215_s4, 4  ;;  %s356_s25 = scalar_lea.hbm %s913_s3, %s460_s5  ;;  %s865_s21 = int_to_ptr.vmem [resolvable:$true] %s358_s21 }
  0x43   : > { %v226_v5 = vrot.slane %v225_v4, 2  ;;  %472 = vmatprep.subr.mxu0 %v707_v9  ;;  %s345_s11 = scalar_lea.sflag [#allocation5], %s848_s8  ;;  %s616_s18 = scalar_lea.vmem %s865_s21, 128 }
  0x44   : > { %473 = vmatpush3.msra.mxu0 %v251_v14  ;;  %p617_p1 = scmp.ne.s32.totalorder %s865_s21, %s616_s18  ;;  %s712_s26 = smov [#allocation8]  }
  0x45   : > { %v227_v6 = vmax.f32 %v225_v4, %v226_v5  ;;  %v230_v8 = vld [vmem:[#allocation2] sm:$0x1]  ;;  %474 = vmatprep.subr.mxu0 %v707_v9  ;;  %s620_s15 = sshll.u32 %s712_s26, 4  ;;  %s621_s15 = int_to_ptr.vmem [resolvable:$false] %s620_s15 }
  0x46   : > { %475 = vmatpush3.msra.mxu0 %v250_v15  ;;  %p618_p8 = pnand %p617_p1, %p820_p13  ;;  %p623_p0 = scmp.lt.s32.totalorder %s865_s21, %s621_s15 }
  0x47   : > { %v228_v7 = vrot.slane %v227_v6, 1 }
  0x48   : > { %p619_p10 = pneg %p618_p8 }
  0x49   : > { %v229_v12 = vmax.f32 %v227_v6, %v228_v7 }
  0x4b   : > { %v231_v13 = vmax.f32 %v230_v8, %v229_v12 }
  0x4d   : > { %232 = vst [vmem:[#allocation2] sm:$0x1] %v231_v13 }
  0x54   : > { %v236_v16 = vld [vmem:[#allocation2] sm:$0x1] }
  0x55   : > { %238 = vrot.lane.b32.xlu0 %v236_v16, %s709_s20  ;;  %246 = vrot.lane.b32.xlu1 %v236_v16, %s710_s22  ;;  %s622_s20 = scalar_lea.vmem %s621_s15, 256 }
  0x56   : > { %p624_p2 = scmp.lt.s32.totalorder %s622_s20, %s616_s18 }
  0x58   : > { %p625_p3 = por %p624_p2, %p623_p0 }
  0x59   : > { %242 = vrot.lane.b32.xlu0 %v236_v16, %s711_s24 }
  0x5a   : > { %p626_p5 = pnand %p625_p3, %p619_p10 }
  0xc7   : > { %v239_v17 = vpop.permute.xlu0 %238  ;;  %v247_v20 = vpop.permute.xlu1 %246 }
  0xc8   : > { %v241_v18 = vmax.f32 %v236_v16, %v239_v17 }
  0xcb   : > { %v243_v19 = vpop.permute.xlu0 %242 }
  0xcc   : > { %v245_v21 = vmax.f32 %v241_v18, %v243_v19 }
  0xce   : > { %v249_v22 = vmax.f32 %v245_v21, %v247_v20 }
  0xd0   : > { %477 = vmatmul.mubr.msk.f32.vlgmr.msra.gmra.mxu0 %vm255_vm2, %v249_v22 }
 0x190   : > { %v325_v24 = vpop.f32.mrf.mxu0 }
 0x191   : > { %v326_v25 = vadd.f32 %v325_v24, %v254_v23 }
 0x192   : > { %v478_v26 = vpop.f32.mrf.mxu0 }
 0x193   : > { %v329_v27 = vmul.f32 %v326_v25, %v326_v25 }
 0x195   : > { %v330_v28 = vand.u32 2147483647, %v329_v27 }
 0x197   : > { %v332_v29 = vsel %vm331_vm3, %v330_v28, 0.0 }
 0x198   : > { %333 = vadd.xlane.f32.xlu1 %v332_v29 }
 0x221   : > { %v334_v30 = vpop.xlane.xlu1 %333 }
 0x222   : > { %v335_v31 = vrot.slane %v334_v30, 4 }
 0x224   : > { %v336_v32 = vadd.f32 %v335_v31, %v334_v30 }
 0x226   : > { %v337_v33 = vrot.slane %v336_v32, 2 }
 0x228   : > { %v338_v34 = vadd.f32 %v337_v33, %v336_v32 }
 0x22a   : > { %v339_v35 = vrot.slane %v338_v34, 1 }
 0x22c   : > { %v340_v36 = vadd.f32 %v339_v35, %v338_v34 }
 0x22e   : > { %479 = vpush %v340_v36 }
 0x25f   : > { %s480_s6 = spop %479 }
 0x260   : > { %v342_v37 = vstv %s480_s6 }
 0x261   : > { %343 = vst [vmem:[%s215_s4] sm:$0xff] %v342_v37 }
 0x262   : > { %629 = shalt.err (!%p626_p5)
}
 0x263   : > { %s630_s22 = scalar_lea.hbm %s356_s25, 128  ;;  %s634_s27 = scalar_lea.hbm %s913_s3, 256 }
 0x264   : > { %p631_p7 = scmp.ne.s32.totalorder %s356_s25, %s630_s22  ;;  %p635_p9 = scmp.lt.s32.totalorder %s356_s25, %s913_s3 }
 0x265   : > { %p636_p11 = scmp.lt.s32.totalorder %s634_s27, %s630_s22 }
 0x266   : > { %p632_p6 = pnand %p631_p7, %p820_p13 }
 0x267   : > { %p637_p12 = por %p636_p11, %p635_p9 }
 0x268   : > { %p633_p4 = pneg %p632_p6 }
 0x26a   : > { %p638_p1 = pnand %p637_p12, %p633_p4 }
 0x26c   : > { %641 = shalt.err (!%p638_p1)
}
 0x26d   : > { %487 = dma.vmem_to_hbm [thread:$0]  (%p820_p13), %s865_s21, 128, %s356_s25, %s345_s11  }
 0x26e PF: > { %s370_s4 = sand.u32 1, %s680_s12   ;;  %p925_p8 = scmp.ne.s32.totalorder %s918_s23, 0 }
 0x26f   : > { %p926_p10 = scmp.ge.s32.totalorder %s700_s17, 2  ;;  %s371_s5 = scalar_lea.sflag [#allocation5], %s370_s4 }
 0x271   : > { %p498_p0 = pnand %p926_p10, %p925_p8 }
 0x273   : > { %p499_p2 = pneg %p498_p0 }
 0x275   : > { %675 = dma.done.wait (%p499_p2), %s371_s5, 128  }
 0x276   : > { %677 = vsyncadd (%p499_p2), %s371_s5, 4294967168  ;;  %s20_s17 = sadd.s32 1, %s700_s17   ;;  %s927_s12 = smov %s684_s13 }
 0x277   : > { %p17_p3 = scmp.ge.s32.totalorder %s20_s17, 4   ;;  %s928_s13 = smov %s688_s14 }
 0x278   : > { %s929_s14 = smov %s829_s19  ;;  %s930_s15 = smov %s696_s16 }
 0x279   : > { %s931_s16 = smov %s933_s28  ;;  %19 = sbr.rel (!%p17_p3) target bundleno = 7 (0x7), region = 89 }
 0x27e   :  { %376 = vsyncpa [#allocation4], 1 }
 0x27f   :  { %378 = vsyncpa [#allocation4 + $0x1], 1 }
 0x280   :  { %379 = vsyncpa [#allocation7], 1 }
 0x281   :  { %380 = vsyncpa [#allocation5], 1 }
 0x282   :  { %382 = vsyncpa [#allocation5 + $0x1], 1 }

</bundles_post_ra>
